<compile_context>
chip_gen: v6e
topology: v6e:2x2x1
jax: 0.10.0
libtpu: 0.0.40
codegen_flags: <defaults>
</compile_context>

<pallas_src>
import jax
import jax.numpy as jnp
from jax.experimental import pallas as pl
from jax.experimental.pallas import tpu as pltpu

_SQRT_2_OVER_PI = 0.7978845608028654  # sqrt(2 / pi)


def _gelu_kernel(x_ref, o_ref):
    # f32 compute everywhere: generation-independent numerics (v5e has no bf16
    # VPU/EUP datapath).  HBM-bound kernel: the polynomial sits on otherwise-idle
    # VALU slots and tanh runs on the EUP slot (separate VLIW slot), so the
    # compute path is effectively free filler under the DMA roofline.
    x = x_ref[...].astype(jnp.float32)
    inner = _SQRT_2_OVER_PI * (x + 0.044715 * (x * x * x))
    y = 0.5 * x * (1.0 + jnp.tanh(inner))
    # NOTE: the ragged last grid block reads garbage rows past `rows` and the
    # masked writeback drops them — harmless for this elementwise op; do NOT
    # inherit this silently into a reduction rewrite.
    o_ref[...] = y.astype(o_ref.dtype)


def _budgets():
    """(target_tile_bytes, vmem_limit_bytes), generation-aware when detectable."""
    tile, limit = 4 * 1024 * 1024, 48 * 1024 * 1024  # safe on v7x's 64 MiB VMEM
    try:
        # 128 MiB-VMEM chips (v5e/v6e): bigger tiles amortize the ~0.35 us/step
        # overhead and issue longer DMAs.  4 buffers x 8 MiB = 32 MiB << limit.
        if int(pltpu.get_tpu_info().vmem_capacity_bytes) >= 100 * 1024 * 1024:
            tile, limit = 8 * 1024 * 1024, 64 * 1024 * 1024
    except Exception:
        pass  # unknown chip -> keep the conservative (v7x-safe) budgets
    return tile, limit


def _choose_layout(n, sub):
    """Pick (lane, pad) so (n + pad) = rows * lane, lane % 128 == 0, rows >= sub."""
    best = None
    for lane in (4096, 2048, 1024, 512, 256, 128):
        if n % lane == 0:
            rows = n // lane
            if rows >= sub and rows % sub == 0:
                return lane, 0          # lane- AND sublane-dense, no padding
            if best is None and rows >= sub:
                best = lane             # lane-dense; ragged sublane tail only
    if best is not None:
        return best, 0
    # No lane-dense factorization (n % 128 != 0, or too few rows): pad once to a
    # multiple of sub*128.  One extra HBM pass << masked vst.msk on every tile.
    unit = sub * 128
    padded = pl.cdiv(n, unit) * unit
    return 128, padded - n


def gelu(x, *, donate=False):
    orig_shape = x.shape
    dtype = x.dtype
    itemsize = jnp.dtype(dtype).itemsize
    sub = {4: 8, 2: 16, 1: 32}.get(itemsize, 8)  # sublane pack multiple per dtype
    n = int(x.size)

    target_tile_bytes, vmem_limit = _budgets()

    lane, pad = _choose_layout(n, sub)
    x_flat = x.reshape(-1)
    if pad:
        x_flat = jnp.pad(x_flat, (0, pad))       # gelu(0) == 0, tail is harmless
    rows = (n + pad) // lane
    x2 = x_flat.reshape(rows, lane)

    # --- tile-row selection (trace-time Python) ------------------------------
    # ~target_tile_bytes per input tile; in+out double-buffered => ~4x in VMEM.
    tr = (target_tile_bytes // (lane * itemsize)) // sub * sub
    tr = max(sub, min(tr, (rows // sub) * sub))
    steps = pl.cdiv(rows, tr)
    # Best effort: even step count when > 1 so v7x's two TensorCores split the
    # grid without tail imbalance (harmless no-op on single-TC v5e/v6e).
    if steps > 1 and steps % 2:
        tr_even = pl.cdiv(pl.cdiv(rows, steps + 1), sub) * sub
        if tr_even >= sub and pl.cdiv(rows, tr_even) % 2 == 0:
            tr = tr_even
            steps = pl.cdiv(rows, tr)

    out = pl.pallas_call(
        _gelu_kernel,
        out_shape=jax.ShapeDtypeStruct((rows, lane), dtype),
        grid_spec=pltpu.PrefetchScalarGridSpec(
            num_scalar_prefetch=0,
            grid=(steps,),  # ragged last block is masked by Pallas; no extra pad
            in_specs=[pl.BlockSpec((tr, lane), lambda i: (i, 0))],
            out_specs=pl.BlockSpec((tr, lane), lambda i: (i, 0)),
        ),
        compiler_params=pltpu.CompilerParams(
            dimension_semantics=("parallel",),
            vmem_limit_bytes=vmem_limit,
        ),
        cost_estimate=pl.CostEstimate(
            flops=8 * rows * lane,
            transcendentals=rows * lane,
            bytes_accessed=2 * rows * lane * itemsize,
        ),
        input_output_aliases=({0: 0} if donate else {}),
    )(x2)

    y = out.reshape(-1)
    if pad:
        y = y[:n]
    return y.reshape(orig_shape)


def gelu_ref(x):
    xf = x.astype(jnp.float32)
    c = jnp.sqrt(jnp.float32(2.0 / jnp.pi))
    return (0.5 * xf * (1.0 + jnp.tanh(c * (xf + 0.044715 * xf**3)))).astype(x.dtype)


if __name__ == "__main__":
    key = jax.random.PRNGKey(0)

    # small transformer-activation-like shape: (batch=2, seq=8, hidden=32)
    x = jax.random.normal(key, (2, 8, 32), dtype=jnp.float32)
    y = gelu(x)
    jax.block_until_ready(y)
    assert y.shape == x.shape and y.dtype == x.dtype
    assert jnp.allclose(y, gelu_ref(x), atol=1e-5, rtol=1e-5)

    # bf16 inputs: f32 compute, bf16 store -> only bf16 rounding error vs f32 ref.
    xb = x.astype(jnp.bfloat16)
    yb = gelu(xb)
    jax.block_until_ready(yb)
    assert yb.dtype == jnp.bfloat16
    assert jnp.allclose(yb.astype(jnp.float32), gelu_ref(x), atol=2e-2, rtol=2e-2)

    # non-128-divisible element count -> exercises the pad-once lane-dense path.
    xo = jax.random.normal(jax.random.PRNGKey(1), (3, 5, 7), dtype=jnp.float32)
    yo = gelu(xo)
    jax.block_until_ready(yo)
    assert jnp.allclose(yo, gelu_ref(xo), atol=1e-5, rtol=1e-5)

    print("KERNEL_OK")
</pallas_src>

<mosaic_0001>
module attributes {stable_mosaic.version = 11 : i64} {
  func.func @_gelu_kernel(%arg0: i32, %arg1: memref<8x128xf32, #tpu.memory_space<vmem>>, %arg2: memref<8x128xf32, #tpu.memory_space<vmem>>) attributes {dimension_semantics = [#tpu.dimension_semantics<parallel>], iteration_bounds = array<i64: 1>, scalar_prefetch = 0 : i64, scratch_operands = 0 : i64, tpu.core_type = #tpu.core_type<tc>, window_params = [{transform_indices = @transform_0, window_bounds = array<i64: 8, 128>}, {transform_indices = @transform_1, window_bounds = array<i64: 8, 128>}]} {
    %c0 = arith.constant 0 : index
    %c0_0 = arith.constant 0 : index
    %0 = vector.load %arg1[%c0, %c0_0] : memref<8x128xf32, #tpu.memory_space<vmem>>, vector<8x128xf32>
    %1 = arith.mulf %0, %0 : vector<8x128xf32>
    %2 = arith.mulf %1, %0 : vector<8x128xf32>
    %cst = arith.constant 4.471500e-02 : f32
    %3 = vector.broadcast %cst : f32 to vector<8x128xf32>
    %4 = arith.mulf %3, %2 : vector<8x128xf32>
    %5 = arith.addf %0, %4 : vector<8x128xf32>
    %cst_1 = arith.constant 0.797884583 : f32
    %6 = vector.broadcast %cst_1 : f32 to vector<8x128xf32>
    %7 = arith.mulf %6, %5 : vector<8x128xf32>
    %cst_2 = arith.constant 5.000000e-01 : f32
    %8 = vector.broadcast %cst_2 : f32 to vector<8x128xf32>
    %9 = arith.mulf %8, %0 : vector<8x128xf32>
    %10 = math.tanh %7 : vector<8x128xf32>
    %cst_3 = arith.constant 1.000000e+00 : f32
    %11 = vector.broadcast %cst_3 : f32 to vector<8x128xf32>
    %12 = arith.addf %11, %10 : vector<8x128xf32>
    %13 = arith.mulf %9, %12 : vector<8x128xf32>
    %c0_4 = arith.constant 0 : index
    %c0_5 = arith.constant 0 : index
    %14 = vector.load %arg2[%c0_4, %c0_5] : memref<8x128xf32, #tpu.memory_space<vmem>>, vector<8x128xf32>
    tpu.vector_store %arg2[%c0_4, %c0_5], %13 {strides = array<i32>} : memref<8x128xf32, #tpu.memory_space<vmem>>, vector<8x128xf32>,
    return
  }
  func.func @transform_0(%arg0: i32) -> (i32, i32) {
    %c0_i32 = arith.constant 0 : i32
    %c0_i32_0 = arith.constant 0 : i32
    return %arg0, %c0_i32 : i32, i32
  }
  func.func @transform_1(%arg0: i32) -> (i32, i32) {
    %c0_i32 = arith.constant 0 : i32
    %c0_i32_0 = arith.constant 0 : i32
    return %arg0, %c0_i32 : i32, i32
  }
}

</mosaic_0001>

<bundles_post_ra>
// kernel: tpu_custom_call.1
= control target key start
LH: loop header
LB: loop body
LE: loop exit
PB: predicated region body
PF: predicated region fallthrough
CT: control target
= control target key end

     0   :  { %6 = vsyncpa [#allocation3], 0  ;;  %s113_s0 = inlined_call_operand.hbm [shape: f32[8,128], index: 0, kind: input, shape index: {}]   ;;  %s114_s1 = inlined_call_operand.hbm [shape: f32[8,128], index: 1, kind: output, shape index: {}]  }
   0x1   :  { %7 = vsyncpa [#allocation4], 0  ;;  %s95_s6 = smov [#allocation2]  }
   0x2   :  { %s14_s7 = sshll.u32 %s95_s6, 4  ;;  %s15_s7 = int_to_ptr.vmem [resolvable:$true] %s14_s7 }
   0x3   :  { %s59_s8 = scalar_lea.vmem %s15_s7, 128  ;;  %p64_p1 = scmp.lt.s32.totalorder %s15_s7, %s15_s7 }
   0x4   :  { %p60_p0 = scmp.ne.s32.totalorder %s15_s7, %s59_s8  ;;  %p65_p2 = scmp.lt.s32.totalorder %s59_s8, %s59_s8 }
   0x6   :  { %p66_p3 = por %p65_p2, %p64_p1 }
   0x8   :  { %p67_p4 = pnand %p66_p3, %p60_p0 }
   0xa   :  { %70 = shalt.err (!%p67_p4)
}
   0xb   :  { %17 = dma.hbm_to_vmem [thread:$0]  %s113_s0, 128, %s15_s7, [#allocation3]  }
   0xc   :  { %91 = dma.done.wait [#allocation3], 128  }
   0xd   :  { %92 = vsyncadd [#allocation3], 4294967168  ;;  %v21_v0 = vld [vmem:[#allocation2] sm:$0xff]  ;;  %s96_s11 = smov [#allocation5]  }
   0xe   :  { %v22_v1 = vmul.f32 %v21_v0, %v21_v0  ;;  %v27_v6 = vmul.f32 0.5, %v21_v0  ;;  %s38_s12 = sshll.u32 %s96_s11, 4  ;;  %s39_s12 = int_to_ptr.vmem [resolvable:$true] %s38_s12 }
   0xf   :  { %s71_s13 = scalar_lea.vmem %s39_s12, 128  ;;  %p76_p6 = scmp.lt.s32.totalorder %s39_s12, %s39_s12 }
  0x10   :  { %v23_v2 = vmul.f32 %v22_v1, %v21_v0  ;;  %p72_p5 = scmp.ne.s32.totalorder %s39_s12, %s71_s13  ;;  %p77_p7 = scmp.lt.s32.totalorder %s71_s13, %s71_s13 }
  0x12   :  { %v24_v3 = vmul.f32 0.044715, %v23_v2  ;;  %p78_p8 = por %p77_p7, %p76_p6 }
  0x14   :  { %v25_v4 = vadd.f32 %v24_v3, %v21_v0  ;;  %p79_p9 = pnand %p78_p8, %p72_p5 }
  0x16   :  { %v26_v5 = vmul.f32 0.7978846, %v25_v4 }
  0x18   :  { %49 = vtanh.f32 %v26_v5 }
  0x25   :  { %v50_v7 = vpop.eup %49 }
  0x26   :  { %v29_v8 = vadd.f32 1.0, %v50_v7 }
  0x28   :  { %v30_v9 = vmul.f32 %v29_v8, %v27_v6 }
  0x2a   :  { %31 = vst [vmem:[#allocation5] sm:$0xff] %v30_v9 }
  0x2b   :  { %82 = shalt.err (!%p79_p9)
}
  0x2c   :  { %41 = dma.vmem_to_hbm [thread:$0]  %s39_s12, 128, %s114_s1, [#allocation4]  }
  0x2d   :  { %93 = dma.done.wait [#allocation4], 128  }
  0x2e   :  { %94 = vsyncadd [#allocation4], 4294967168 }
  0x2f   :  { %45 = vsyncpa [#allocation3], 1 }
  0x30   :  { %46 = vsyncpa [#allocation4], 1 }

</bundles_post_ra>
